<compile_context>
chip_gen: v6e
topology: v6e:2x2x1
jax: 0.10.0
libtpu: 0.0.40
codegen_flags: <defaults>
</compile_context>

<pallas_src>
import functools

import jax
import jax.numpy as jnp
from jax import lax
from jax.experimental import pallas as pl
from jax.experimental.pallas import tpu as pltpu

LANES = 128          # lane-dense last dim
MAX_TILE_ROWS = 2048 # sublane rows per grid step (1 MiB f32 per input tile)
NCORES = 2           # manual split of the reduction across TensorCores
ACC_ROWS = 8         # vreg-shaped accumulator rows


# --------------------------------------------------------------------------
# Static tiling helpers
# --------------------------------------------------------------------------
def _tiling(n):
    """rows = ceil(n/128); whole array as one block when it fits a tile."""
    rows = -(-n // LANES)
    tile_r = rows if rows <= MAX_TILE_ROWS else MAX_TILE_ROWS
    num_tiles = -(-rows // tile_r)
    return rows, tile_r, num_tiles


def _lane_view(x, rows):
    """Flatten to a lane-dense (rows, 128) view.

    Zero-copy reshape when x.size is a multiple of 128; otherwise only the
    sub-128 tail is zero-padded (the padded/undefined region is masked out or
    contributes exactly zero in-kernel)."""
    flat = x.reshape(-1)
    pad = rows * LANES - flat.shape[0]
    if pad:
        flat = jnp.pad(flat, (0, pad))
    return flat.reshape(rows, LANES)


# --------------------------------------------------------------------------
# In-kernel helpers
# --------------------------------------------------------------------------
def _fold_rows(x, tile_r, acc_rows):
    """Reduce a (tile_r, 128) f32 tile to the (acc_rows, 128) accumulator shape.

    When tile_r is a multiple of 8 this is a pure-VALU vreg-wise add (the
    reshape keeps the minor dim, so it is layout-free); for tiny single-block
    inputs acc_rows == tile_r and the tile is used as-is."""
    if acc_rows == tile_r:
        return x
    return x.reshape(tile_r // acc_rows, acc_rows, LANES).sum(axis=0)


def _last_block_mask(n, tile_r, num_tiles):
    """Validity mask for the last tile (static constants; no i32 overflow:
    the limit is a per-block offset <= tile_r * 128)."""
    limit = n - (num_tiles - 1) * tile_r * LANES
    rid = lax.broadcasted_iota(jnp.int32, (tile_r, LANES), 0)
    lid = lax.broadcasted_iota(jnp.int32, (tile_r, LANES), 1)
    return (rid * LANES + lid) < limit


def _guarded_accumulate(accumulate, j, num_tiles, needs_mask, has_filler):
    """Run `accumulate` with masking only on the last valid tile; skip filler
    steps of the core-split grid (j >= num_tiles)."""
    last = num_tiles - 1
    if needs_mask:
        @pl.when(j == last)
        def _masked():
            accumulate(True)

        if num_tiles > 1:
            @pl.when(j < last)
            def _unmasked():
                accumulate(False)
    elif has_filler:
        @pl.when(j <= last)
        def _valid():
            accumulate(False)
    else:
        accumulate(False)


# --------------------------------------------------------------------------
# Kernels
# --------------------------------------------------------------------------
def _make_mean_kernel(n, tile_r, num_tiles, tiles_per_core, ncores, acc_rows):
    """Pass 1 for 'ragan': per-core/lane partial sums of real & fake_D scores.

    Single combined output block of width 2*128: columns [:128] accumulate
    real, columns [128:] accumulate fake_D."""
    needs_mask = (num_tiles * tile_r * LANES) != n
    has_filler = (ncores * tiles_per_core) != num_tiles

    def kernel(real_ref, fd_ref, out_ref):
        c = pl.program_id(0)
        i = pl.program_id(1)
        j = c * tiles_per_core + i      # virtual global tile index

        @pl.when(i == 0)
        def _init():
            out_ref[...] = jnp.zeros_like(out_ref)

        def accumulate(masked):
            real = real_ref[...].astype(jnp.float32)
            fd = fd_ref[...].astype(jnp.float32)
            if masked:
                m = _last_block_mask(n, tile_r, num_tiles)
                real = jnp.where(m, real, 0.0)
                fd = jnp.where(m, fd, 0.0)
            out_ref[:, :LANES] += _fold_rows(real, tile_r, acc_rows)
            out_ref[:, LANES:] += _fold_rows(fd, tile_r, acc_rows)

        _guarded_accumulate(accumulate, j, num_tiles, needs_mask, has_filler)

    return kernel


def _make_hinge_kernel(gan_type, n, tile_r, num_tiles, tiles_per_core, ncores,
                       acc_rows):
    """Single streaming pass over the three score tensors producing per-core
    partial sums of the D and G hinge terms."""
    needs_mask = (num_tiles * tile_r * LANES) != n
    has_filler = (ncores * tiles_per_core) != num_tiles
    use_means = gan_type == "ragan"

    def kernel(*refs):
        if use_means:
            means_ref, real_ref, fd_ref, fg_ref, d_out, g_out = refs
        else:
            real_ref, fd_ref, fg_ref, d_out, g_out = refs

        c = pl.program_id(0)
        i = pl.program_id(1)
        j = c * tiles_per_core + i

        @pl.when(i == 0)
        def _init():
            d_out[...] = jnp.zeros_like(d_out)
            g_out[...] = jnp.zeros_like(g_out)

        def accumulate(masked):
            real = real_ref[...].astype(jnp.float32)
            fake_d = fd_ref[...].astype(jnp.float32)
            fake_g = fg_ref[...].astype(jnp.float32)

            # ---- get_dis_preds (static branch on gan_type) ----------------
            if gan_type == "gan":
                real_pred, fake_pred_d, fake_pred_g = real, fake_d, fake_g
            elif gan_type == "rgan":
                real_pred = real - fake_d
                fake_pred_d = fake_d - real
                fake_pred_g = fake_g - real
            else:  # 'ragan': relativistic-average means read as SMEM scalars
                real_mean = means_ref[0]
                fake_d_mean = means_ref[1]
                real_pred = real - fake_d_mean
                fake_pred_d = fake_d - real_mean
                fake_pred_g = fake_g - real_mean

            # ---- per-element hinge terms ----------------------------------
            d_elem = (jnp.maximum(1.0 - real_pred, 0.0)
                      + jnp.maximum(1.0 + fake_pred_d, 0.0))
            if gan_type == "gan":
                g_elem = -fake_pred_g
            else:  # 'rgan' / 'ragan'
                g_elem = (jnp.maximum(1.0 + real_pred, 0.0)
                          + jnp.maximum(1.0 - fake_pred_g, 0.0))

            if masked:  # select (not multiply) so undefined tail data is safe
                m = _last_block_mask(n, tile_r, num_tiles)
                d_elem = jnp.where(m, d_elem, 0.0)
                g_elem = jnp.where(m, g_elem, 0.0)

            d_out[...] += _fold_rows(d_elem, tile_r, acc_rows)
            g_out[...] += _fold_rows(g_elem, tile_r, acc_rows)

        _guarded_accumulate(accumulate, j, num_tiles, needs_mask, has_filler)

    return kernel


# --------------------------------------------------------------------------
# Wrapper
# --------------------------------------------------------------------------
@functools.partial(jax.jit, static_argnums=(0,))
def adversarial_criterion(gan_type, fake_score_G, fake_score_D, real_score):
    """Pallas implementation of Criterion.forward.

    Returns ({'adversarial_G': loss_G}, {'adversarial_D': loss_D}) as scalars.
    """
    if gan_type not in ("gan", "rgan", "ragan"):
        raise Exception("Incorrect `gan_type` argument")

    n = real_score.size
    assert fake_score_G.size == n and fake_score_D.size == n

    rows, tile_r, num_tiles = _tiling(n)
    ncores = NCORES if num_tiles >= NCORES else 1
    tiles_per_core = -(-num_tiles // ncores)
    acc_rows = ACC_ROWS if tile_r % ACC_ROWS == 0 else tile_r
    inv_n = 1.0 / float(n)
    itemsize = jnp.dtype(real_score.dtype).itemsize

    # Lane-dense views (zero-copy when n % 128 == 0; no tile-multiple padding).
    real2 = _lane_view(real_score, rows)
    fd2 = _lane_view(fake_score_D, rows)
    fg2 = _lane_view(fake_score_G, rows)

    # Virtual tile index = c * tiles_per_core + i; clamp only if a filler step
    # exists (its DMA then redundantly re-reads the last valid block and the
    # kernel skips accumulation for it).
    if ncores * tiles_per_core == num_tiles:
        def tile_map(c, i):
            return (c * tiles_per_core + i, 0)
    else:
        def tile_map(c, i):
            return (jnp.minimum(c * tiles_per_core + i, num_tiles - 1), 0)

    tile_spec = pl.BlockSpec((tile_r, LANES), tile_map)
    part_spec = pl.BlockSpec((acc_rows, LANES), lambda c, i: (c, 0))
    grid = (ncores, tiles_per_core)
    cparams = pltpu.CompilerParams(
        dimension_semantics=("parallel", "arbitrary"))

    hinge_inputs = (real2, fd2, fg2)
    hinge_in_specs = [tile_spec, tile_spec, tile_spec]

    if gan_type == "ragan":
        # Pass 1: stream real / fake_D once for the relativistic-average sums.
        mean_part = pl.pallas_call(
            _make_mean_kernel(n, tile_r, num_tiles, tiles_per_core, ncores,
                              acc_rows),
            out_shape=jax.ShapeDtypeStruct((ncores * acc_rows, 2 * LANES),
                                           jnp.float32),
            grid_spec=pltpu.PrefetchScalarGridSpec(
                num_scalar_prefetch=0,
                grid=grid,
                in_specs=[tile_spec, tile_spec],
                out_specs=pl.BlockSpec((acc_rows, 2 * LANES),
                                       lambda c, i: (c, 0)),
            ),
            compiler_params=cparams,
            cost_estimate=pl.CostEstimate(
                flops=2 * n, transcendentals=0,
                bytes_accessed=2 * n * itemsize),
        )(real2, fd2)
        # Tiny wrapper reduce: per-core/lane partial sums -> the two means,
        # already shaped (2,) f32 for the SMEM operand (no concat glue).
        means = mean_part.reshape(-1, 2, LANES).sum(axis=(0, 2)) * inv_n
        hinge_inputs = (means,) + hinge_inputs
        hinge_in_specs = (
            [pl.BlockSpec(memory_space=pltpu.MemorySpace.SMEM)]
            + hinge_in_specs)

    # Pass 2 (or only pass for 'gan'/'rgan'): streamed hinge partial sums.
    d_part, g_part = pl.pallas_call(
        _make_hinge_kernel(gan_type, n, tile_r, num_tiles, tiles_per_core,
                           ncores, acc_rows),
        out_shape=(jax.ShapeDtypeStruct((ncores * acc_rows, LANES),
                                        jnp.float32),
                   jax.ShapeDtypeStruct((ncores * acc_rows, LANES),
                                        jnp.float32)),
        grid_spec=pltpu.PrefetchScalarGridSpec(
            num_scalar_prefetch=0,
            grid=grid,
            in_specs=hinge_in_specs,
            out_specs=(part_spec, part_spec),
        ),
        compiler_params=cparams,
        cost_estimate=pl.CostEstimate(
            flops=12 * n, transcendentals=0,
            bytes_accessed=3 * n * itemsize),
    )(*hinge_inputs)

    loss_g = g_part.sum() * inv_n
    loss_d = d_part.sum() * inv_n
    return {"adversarial_G": loss_g}, {"adversarial_D": loss_d}


# --------------------------------------------------------------------------
# Pure-jnp reference (mirrors the PyTorch module)
# --------------------------------------------------------------------------
def _reference(gan_type, fake_score_G, fake_score_D, real_score):
    def get_dis_preds(real, fake):
        if gan_type == "gan":
            return real, fake
        if gan_type == "rgan":
            return real - fake, fake - real
        if gan_type == "ragan":
            return real - fake.mean(), fake - real.mean()
        raise Exception("Incorrect `gan_type` argument")

    real_pred, fake_pred_D = get_dis_preds(real_score, fake_score_D)
    _, fake_pred_G = get_dis_preds(real_score, fake_score_G)
    loss_D = (jnp.maximum(1.0 - real_pred, 0.0).mean()
              + jnp.maximum(1.0 + fake_pred_D, 0.0).mean())
    if gan_type == "gan":
        loss_G = -fake_pred_G.mean()
    else:
        loss_G = (jnp.maximum(1.0 + real_pred, 0.0).mean()
                  + jnp.maximum(1.0 - fake_pred_G, 0.0).mean())
    return loss_G, loss_D


if __name__ == "__main__":
    key = jax.random.PRNGKey(0)
    k1, k2, k3 = jax.random.split(key, 3)

    ok = True
    # Shapes: small lane-aligned, small with a non-128 tail (masked path), and
    # a multi-tile case exercising the two-core split + filler skip + partial
    # last block.
    for shape in ((2, 1, 16, 16), (2, 1, 7, 9), (2, 1, 384, 768)):
        fake_score_G = jax.random.normal(k1, shape, dtype=jnp.float32)
        fake_score_D = jax.random.normal(k2, shape, dtype=jnp.float32)
        real_score = jax.random.normal(k3, shape, dtype=jnp.float32)

        for gan_type in ("gan", "rgan", "ragan"):
            loss_G_dict, loss_D_dict = adversarial_criterion(
                gan_type, fake_score_G, fake_score_D, real_score)
            lg = jax.block_until_ready(loss_G_dict["adversarial_G"])
            ld = jax.block_until_ready(loss_D_dict["adversarial_D"])
            ref_g, ref_d = _reference(gan_type, fake_score_G, fake_score_D,
                                      real_score)
            ok &= bool(jnp.allclose(lg, ref_g, atol=1e-5, rtol=1e-4))
            ok &= bool(jnp.allclose(ld, ref_d, atol=1e-5, rtol=1e-4))

    print("KERNEL_OK" if ok else "MISMATCH")
</pallas_src>

<mosaic_0001>
module attributes {stable_mosaic.version = 11 : i64} {
  func.func @kernel(%arg0: i32, %arg1: i32, %arg2: memref<4x128xf32, #tpu.memory_space<vmem>>, %arg3: memref<4x128xf32, #tpu.memory_space<vmem>>, %arg4: memref<4x128xf32, #tpu.memory_space<vmem>>, %arg5: memref<4x128xf32, #tpu.memory_space<vmem>>, %arg6: memref<4x128xf32, #tpu.memory_space<vmem>>) attributes {dimension_semantics = [#tpu.dimension_semantics<parallel>, #tpu.dimension_semantics<arbitrary>], iteration_bounds = array<i64: 1, 1>, scalar_prefetch = 0 : i64, scratch_operands = 0 : i64, tpu.core_type = #tpu.core_type<tc>, window_params = [{transform_indices = @transform_0, window_bounds = array<i64: 4, 128>}, {transform_indices = @transform_1, window_bounds = array<i64: 4, 128>}, {transform_indices = @transform_2, window_bounds = array<i64: 4, 128>}, {transform_indices = @transform_3, window_bounds = array<i64: 4, 128>}, {transform_indices = @transform_4, window_bounds = array<i64: 4, 128>}]} {
    %c0_i32 = arith.constant 0 : i32
    %0 = arith.cmpi eq, %arg1, %c0_i32 : i32
    %1 = arith.extui %0 : i1 to i32
    %c0_i32_0 = arith.constant 0 : i32
    %2 = arith.cmpi ne, %1, %c0_i32_0 : i32
    scf.if %2 {
      %cst_18 = arith.constant 0.000000e+00 : f32
      %23 = vector.broadcast %cst_18 : f32 to vector<4x128xf32>
      %c0_19 = arith.constant 0 : index
      %c0_20 = arith.constant 0 : index
      %24 = vector.load %arg5[%c0_19, %c0_20] : memref<4x128xf32, #tpu.memory_space<vmem>>, vector<4x128xf32>
      tpu.vector_store %arg5[%c0_19, %c0_20], %23 {strides = array<i32>} : memref<4x128xf32, #tpu.memory_space<vmem>>, vector<4x128xf32>,
      %cst_21 = arith.constant 0.000000e+00 : f32
      %25 = vector.broadcast %cst_21 : f32 to vector<4x128xf32>
      %c0_22 = arith.constant 0 : index
      %c0_23 = arith.constant 0 : index
      %26 = vector.load %arg6[%c0_22, %c0_23] : memref<4x128xf32, #tpu.memory_space<vmem>>, vector<4x128xf32>
      tpu.vector_store %arg6[%c0_22, %c0_23], %25 {strides = array<i32>} : memref<4x128xf32, #tpu.memory_space<vmem>>, vector<4x128xf32>,
    } else {
    }
    %c0 = arith.constant 0 : index
    %c0_1 = arith.constant 0 : index
    %3 = vector.load %arg2[%c0, %c0_1] : memref<4x128xf32, #tpu.memory_space<vmem>>, vector<4x128xf32>
    %c0_2 = arith.constant 0 : index
    %c0_3 = arith.constant 0 : index
    %4 = vector.load %arg3[%c0_2, %c0_3] : memref<4x128xf32, #tpu.memory_space<vmem>>, vector<4x128xf32>
    %c0_4 = arith.constant 0 : index
    %c0_5 = arith.constant 0 : index
    %5 = vector.load %arg4[%c0_4, %c0_5] : memref<4x128xf32, #tpu.memory_space<vmem>>, vector<4x128xf32>
    %cst = arith.constant 1.000000e+00 : f32
    %6 = vector.broadcast %cst : f32 to vector<4x128xf32>
    %7 = arith.subf %6, %3 : vector<4x128xf32>
    %cst_6 = arith.constant 0.000000e+00 : f32
    %8 = vector.broadcast %cst_6 : f32 to vector<4x128xf32>
    %9 = arith.maximumf %7, %8 : vector<4x128xf32>
    %cst_7 = arith.constant 1.000000e+00 : f32
    %10 = vector.broadcast %cst_7 : f32 to vector<4x128xf32>
    %11 = arith.addf %10, %4 : vector<4x128xf32>
    %cst_8 = arith.constant 0.000000e+00 : f32
    %12 = vector.broadcast %cst_8 : f32 to vector<4x128xf32>
    %13 = arith.maximumf %11, %12 : vector<4x128xf32>
    %14 = arith.addf %9, %13 : vector<4x128xf32>
    %cst_9 = arith.constant 0.000000e+00 : f32
    %15 = vector.broadcast %cst_9 : f32 to vector<4x128xf32>
    %16 = arith.subf %15, %5 : vector<4x128xf32>
    %c0_10 = arith.constant 0 : index
    %c0_11 = arith.constant 0 : index
    %17 = vector.load %arg5[%c0_10, %c0_11] : memref<4x128xf32, #tpu.memory_space<vmem>>, vector<4x128xf32>
    %18 = arith.addf %17, %14 : vector<4x128xf32>
    %c0_12 = arith.constant 0 : index
    %c0_13 = arith.constant 0 : index
    %19 = vector.load %arg5[%c0_12, %c0_13] : memref<4x128xf32, #tpu.memory_space<vmem>>, vector<4x128xf32>
    tpu.vector_store %arg5[%c0_12, %c0_13], %18 {strides = array<i32>} : memref<4x128xf32, #tpu.memory_space<vmem>>, vector<4x128xf32>,
    %c0_14 = arith.constant 0 : index
    %c0_15 = arith.constant 0 : index
    %20 = vector.load %arg6[%c0_14, %c0_15] : memref<4x128xf32, #tpu.memory_space<vmem>>, vector<4x128xf32>
    %21 = arith.addf %20, %16 : vector<4x128xf32>
    %c0_16 = arith.constant 0 : index
    %c0_17 = arith.constant 0 : index
    %22 = vector.load %arg6[%c0_16, %c0_17] : memref<4x128xf32, #tpu.memory_space<vmem>>, vector<4x128xf32>
    tpu.vector_store %arg6[%c0_16, %c0_17], %21 {strides = array<i32>} : memref<4x128xf32, #tpu.memory_space<vmem>>, vector<4x128xf32>,
    return
  }
  func.func @transform_0(%arg0: i32, %arg1: i32) -> (i32, i32) {
    %c1_i32 = arith.constant 1 : i32
    %0 = arith.muli %arg0, %c1_i32 : i32
    %1 = arith.addi %0, %arg1 : i32
    %c0_i32 = arith.constant 0 : i32
    %c0_i32_0 = arith.constant 0 : i32
    return %1, %c0_i32 : i32, i32
  }
  func.func @transform_1(%arg0: i32, %arg1: i32) -> (i32, i32) {
    %c1_i32 = arith.constant 1 : i32
    %0 = arith.muli %arg0, %c1_i32 : i32
    %1 = arith.addi %0, %arg1 : i32
    %c0_i32 = arith.constant 0 : i32
    %c0_i32_0 = arith.constant 0 : i32
    return %1, %c0_i32 : i32, i32
  }
  func.func @transform_2(%arg0: i32, %arg1: i32) -> (i32, i32) {
    %c1_i32 = arith.constant 1 : i32
    %0 = arith.muli %arg0, %c1_i32 : i32
    %1 = arith.addi %0, %arg1 : i32
    %c0_i32 = arith.constant 0 : i32
    %c0_i32_0 = arith.constant 0 : i32
    return %1, %c0_i32 : i32, i32
  }
  func.func @transform_3(%arg0: i32, %arg1: i32) -> (i32, i32) {
    %c0_i32 = arith.constant 0 : i32
    %c0_i32_0 = arith.constant 0 : i32
    return %arg0, %c0_i32 : i32, i32
  }
  func.func @transform_4(%arg0: i32, %arg1: i32) -> (i32, i32) {
    %c0_i32 = arith.constant 0 : i32
    %c0_i32_0 = arith.constant 0 : i32
    return %arg0, %c0_i32 : i32, i32
  }
}

</mosaic_0001>

<bundles_post_ra>
// kernel: adversarial_criterion.1
= control target key start
LH: loop header
LB: loop body
LE: loop exit
PB: predicated region body
PF: predicated region fallthrough
CT: control target
= control target key end

     0   :  { %v115_v0 = vmov 0.0   ;;  %s168_s3 = inlined_call_operand.vmem [shape: f32[4,128], index: 3, kind: output, shape index: {0}]   ;;  %s169_s4 = inlined_call_operand.vmem [shape: f32[4,128], index: 4, kind: output, shape index: {1}]   ;;  %s170_s0 = inlined_call_operand.vmem [shape: f32[4,128], index: 0, kind: input, shape index: {}]   ;;  %s171_s1 = inlined_call_operand.vmem [shape: f32[4,128], index: 1, kind: input, shape index: {}]   ;;  %s172_s2 = inlined_call_operand.vmem [shape: f32[4,128], index: 2, kind: input, shape index: {}]  }
   0x1   :  { %71 = vst [vmem:[%s168_s3] sm:$0xf] %v115_v0  ;;  %72 = vst [vmem:[%s169_s4] sm:$0xf] %v115_v0  ;;  %v73_v1 = vld [vmem:[%s170_s0] sm:$0xf] }
   0x2   :  { %v74_v2 = vld [vmem:[%s171_s1] sm:$0xf]  ;;  %v76_v3 = vsub.f32 1.0, %v73_v1 }
   0x3   :  { %v78_v4 = vadd.f32 1.0, %v74_v2  ;;  %v75_v5 = vld [vmem:[%s172_s2] sm:$0xf] }
   0x4   :  { %v77_v6 = vmax.f32 %v76_v3, 0.0  ;;  %v81_v8 = vsub.f32 0.0, %v75_v5 }
   0x5   :  { %v79_v7 = vmax.f32 %v78_v4, 0.0 }
   0x7   :  { %v80_v9 = vadd.f32 %v79_v7, %v77_v6 }
   0x8   :  { %v82_v10 = vld [vmem:[%s168_s3] sm:$0xf] }
   0x9   :  { %v85_v11 = vld [vmem:[%s169_s4] sm:$0xf]  ;;  %v83_v12 = vadd.f32 %v82_v10, %v80_v9 }
   0xa   :  { %v86_v13 = vadd.f32 %v85_v11, %v81_v8 }
   0xb   :  { %84 = vst [vmem:[%s168_s3] sm:$0xf] %v83_v12 }
   0xc   :  { %87 = vst [vmem:[%s169_s4] sm:$0xf] %v86_v13 }

</bundles_post_ra>
